<compile_context>
chip_gen: v7x
topology: tpu7x:2x2x1
jax: 0.10.0
libtpu: 0.0.40
codegen_flags: <defaults>
</compile_context>

<pallas_src>
import functools

import jax
import jax.numpy as jnp
from jax.experimental import pallas as pl
from jax.experimental.pallas import tpu as pltpu

LANE = 128        # TPU lane width (last-dim tile)
MAX_TILE = 4096   # rows per grid step; 4096x128 f32 = 2 MiB per input block


def _round_up(x, m):
    return (x + m - 1) // m * m


def _num_tensorcores():
    """Best-effort TensorCores-per-chip (2 on v7x, 1 on v5e/v6e).

    Falls back to 2, which stays correct everywhere: the surplus leading grid
    iterations are fully masked in-kernel and cost at most one tiny re-read."""
    try:
        info = pltpu.get_tpu_info()
        for name in ("num_cores", "core_count", "num_tensorcores",
                     "tensorcores_per_chip", "cores_per_chip"):
            n = getattr(info, name, None)
            if n is not None:
                n = int(n)
                if n >= 1:
                    return min(2, n)
    except Exception:
        pass
    return 2


def _bce_sum_kernel(flag_ref, truth_ref, out_ref, *, rows, tile, bpc, full_blocks):
    """Accumulate sum of  y*log(x) + (1-y)*log(1-x)  (each log clamped at -100).

    flag_ref / truth_ref : (tile, LANE) VMEM blocks of the (rows, LANE) slab.
    out_ref              : (8, LANE) f32 per-core partial-sum accumulator,
                           resident across the 'arbitrary' grid axis.
    rows / tile / bpc / full_blocks are static Python ints.
    """
    c = pl.program_id(0)          # parallel (per-TensorCore) axis
    i = pl.program_id(1)          # sequential (arbitrary / reduction) axis
    blk = c * bpc + i             # raw (unclamped) row-block index

    @pl.when(i == 0)
    def _():
        out_ref[...] = jnp.zeros_like(out_ref)

    def _pos_loss(x, y):
        # PyTorch BCELoss clamps each log term at -100.  Rewritten as
        # log_1mx + y*(log_x - log_1mx) to shave two VALU ops per element;
        # the overall negation is folded into the wrapper's final scalar.
        log_x = jnp.maximum(jnp.log(x), -100.0)
        log_1mx = jnp.maximum(jnp.log(1.0 - x), -100.0)
        return log_1mx + y * (log_x - log_1mx)

    # Fast path: every row of this block is a real input row -> no mask math.
    @pl.when(blk < full_blocks)
    def _():
        per = _pos_loss(flag_ref[...].astype(jnp.float32),
                        truth_ref[...].astype(jnp.float32))
        # (tile, LANE) -> (8, LANE) sublane-aligned partial sums (pure VPU,
        # hides under the input DMAs).
        out_ref[...] += per.reshape(tile // 8, 8, LANE).sum(axis=0)

    # Slow path: the (at most one) ragged boundary block plus any overrun grid
    # iterations (the index_map clamps those onto the last block).  Row-mask
    # BEFORE the log so padded / stale block contents can never produce NaN.
    @pl.when(blk >= full_blocks)
    def _():
        row_ids = blk * tile + jax.lax.broadcasted_iota(jnp.int32, (tile, LANE), 0)
        valid = row_ids < rows
        x = jnp.where(valid, flag_ref[...].astype(jnp.float32), 0.5)
        y = jnp.where(valid, truth_ref[...].astype(jnp.float32), 0.0)
        per = jnp.where(valid, _pos_loss(x, y), 0.0)
        out_ref[...] += per.reshape(tile // 8, 8, LANE).sum(axis=0)


def flag_loss(flag, truth):
    """rate = BCELoss(flag, truth) with mean reduction (PyTorch semantics)."""
    assert flag.shape == truth.shape
    total = flag.size

    flat_f = flag.reshape(-1)
    flat_t = truth.reshape(-1)

    rows = total // LANE          # full lane-dense rows handled by the kernel
    tail = total - rows * LANE    # <=127 ragged elements handled in plain JAX

    ncores = _num_tensorcores()

    if rows > 0:
        # For lane-aligned totals these slices are the whole array (no copy).
        # For ragged totals XLA may materialize the prefix slice once; the
        # ragged tail itself never enters the kernel.
        f2 = flat_f[: rows * LANE].reshape(rows, LANE)
        t2 = flat_t[: rows * LANE].reshape(rows, LANE)

        tile = min(MAX_TILE, _round_up(rows, 8))
        nblocks = pl.cdiv(rows, tile)
        full_blocks = rows // tile           # blocks whose rows are all valid
        bpc = pl.cdiv(nblocks, ncores)       # row-blocks per core
        grid = (ncores, bpc)

        # Clamp the row-block index so grid points past the end simply re-read
        # the last block; those iterations are fully masked in-kernel.
        def in_map(c, i):
            return (jnp.minimum(c * bpc + i, nblocks - 1), 0)

        itemsize = f2.dtype.itemsize + t2.dtype.itemsize
        cost = pl.CostEstimate(
            flops=7 * rows * LANE,
            transcendentals=2 * rows * LANE,
            bytes_accessed=rows * LANE * itemsize + ncores * 8 * LANE * 4,
        )

        kernel = functools.partial(
            _bce_sum_kernel, rows=rows, tile=tile, bpc=bpc, full_blocks=full_blocks)

        partials = pl.pallas_call(
            kernel,
            out_shape=jax.ShapeDtypeStruct((ncores * 8, LANE), jnp.float32),
            grid=grid,
            in_specs=[
                pl.BlockSpec((tile, LANE), in_map),
                pl.BlockSpec((tile, LANE), in_map),
            ],
            out_specs=pl.BlockSpec((8, LANE), lambda c, i: (c, 0)),
            compiler_params=pltpu.CompilerParams(
                dimension_semantics=("parallel", "arbitrary"),
            ),
            cost_estimate=cost,
        )(f2, t2)
        body_sum = jnp.sum(partials)
    else:
        body_sum = jnp.float32(0.0)

    if tail > 0:
        # Ragged tail (<=127 elements): negligible cost in plain JAX.
        xt = flat_f[rows * LANE:].astype(jnp.float32)
        yt = flat_t[rows * LANE:].astype(jnp.float32)
        log_x = jnp.maximum(jnp.log(xt), -100.0)
        log_1mx = jnp.maximum(jnp.log(1.0 - xt), -100.0)
        body_sum = body_sum + jnp.sum(log_1mx + yt * (log_x - log_1mx))

    # Kernel accumulates the *positive* log-likelihood sum; negate once here
    # and divide by the true element count (float count avoids int overflow).
    return -body_sum / jnp.float32(total)


def _reference_bce(flag, truth):
    x = flag.astype(jnp.float32)
    y = truth.astype(jnp.float32)
    log_x = jnp.maximum(jnp.log(x), -100.0)
    log_1mx = jnp.maximum(jnp.log(1.0 - x), -100.0)
    return jnp.mean(-(y * log_x + (1.0 - y) * log_1mx))


if __name__ == "__main__":
    key = jax.random.PRNGKey(0)
    k1, k2 = jax.random.split(key)

    # Small shapes consistent with a per-pixel flag map: (batch=2, C=4, H=16, W=16)
    shape = (2, 4, 16, 16)
    # "flag" is a sigmoid-like probability in (0, 1); "truth" is a binary target.
    flag = jax.nn.sigmoid(jax.random.normal(k1, shape, dtype=jnp.float32))
    truth = (jax.random.uniform(k2, shape) > 0.5).astype(jnp.float32)

    rate = jax.block_until_ready(flag_loss(flag, truth))
    ref = jax.block_until_ready(_reference_bce(flag, truth))
    assert jnp.allclose(rate, ref, rtol=1e-5, atol=1e-6), (rate, ref)

    print("KERNEL_OK")
</pallas_src>

<mosaic_0001>
module attributes {stable_mosaic.version = 11 : i64} {
  func.func @_bce_sum_kernel(%arg0: i32, %arg1: i32, %arg2: memref<16x128xf32, #tpu.memory_space<vmem>>, %arg3: memref<16x128xf32, #tpu.memory_space<vmem>>, %arg4: memref<8x128xf32, #tpu.memory_space<vmem>>) attributes {dimension_semantics = [#tpu.dimension_semantics<parallel>, #tpu.dimension_semantics<arbitrary>], iteration_bounds = array<i64: 2, 1>, scalar_prefetch = 0 : i64, scratch_operands = 0 : i64, tpu.core_type = #tpu.core_type<tc>, window_params = [{transform_indices = @transform_0, window_bounds = array<i64: 16, 128>}, {transform_indices = @transform_1, window_bounds = array<i64: 16, 128>}, {transform_indices = @transform_2, window_bounds = array<i64: 8, 128>}]} {
    %c1_i32 = arith.constant 1 : i32
    %0 = arith.muli %arg0, %c1_i32 : i32
    %1 = arith.addi %0, %arg1 : i32
    %c0_i32 = arith.constant 0 : i32
    %2 = arith.cmpi eq, %arg1, %c0_i32 : i32
    %3 = arith.extui %2 : i1 to i32
    %c0_i32_0 = arith.constant 0 : i32
    %4 = arith.cmpi ne, %3, %c0_i32_0 : i32
    scf.if %4 {
      %cst = arith.constant 0.000000e+00 : f32
      %11 = vector.broadcast %cst : f32 to vector<8x128xf32>
      %c0 = arith.constant 0 : index
      %c0_5 = arith.constant 0 : index
      %12 = vector.load %arg4[%c0, %c0_5] : memref<8x128xf32, #tpu.memory_space<vmem>>, vector<8x128xf32>
      tpu.vector_store %arg4[%c0, %c0_5], %11 {strides = array<i32>} : memref<8x128xf32, #tpu.memory_space<vmem>>, vector<8x128xf32>,
    } else {
    }
    %c1_i32_1 = arith.constant 1 : i32
    %5 = arith.cmpi slt, %1, %c1_i32_1 : i32
    %6 = arith.extui %5 : i1 to i32
    %c0_i32_2 = arith.constant 0 : i32
    %7 = arith.cmpi ne, %6, %c0_i32_2 : i32
    scf.if %7 {
      %c0 = arith.constant 0 : index
      %c0_5 = arith.constant 0 : index
      %11 = vector.load %arg2[%c0, %c0_5] : memref<16x128xf32, #tpu.memory_space<vmem>>, vector<16x128xf32>
      %c0_6 = arith.constant 0 : index
      %c0_7 = arith.constant 0 : index
      %12 = vector.load %arg3[%c0_6, %c0_7] : memref<16x128xf32, #tpu.memory_space<vmem>>, vector<16x128xf32>
      %13 = math.log %11 : vector<16x128xf32>
      %cst = arith.constant -1.000000e+02 : f32
      %14 = vector.broadcast %cst : f32 to vector<16x128xf32>
      %15 = arith.maximumf %13, %14 : vector<16x128xf32>
      %cst_8 = arith.constant 1.000000e+00 : f32
      %16 = vector.broadcast %cst_8 : f32 to vector<16x128xf32>
      %17 = arith.subf %16, %11 : vector<16x128xf32>
      %18 = math.log %17 : vector<16x128xf32>
      %cst_9 = arith.constant -1.000000e+02 : f32
      %19 = vector.broadcast %cst_9 : f32 to vector<16x128xf32>
      %20 = arith.maximumf %18, %19 : vector<16x128xf32>
      %21 = arith.subf %15, %20 : vector<16x128xf32>
      %22 = arith.mulf %12, %21 : vector<16x128xf32>
      %23 = arith.addf %20, %22 : vector<16x128xf32>
      %c0_10 = arith.constant 0 : index
      %c0_11 = arith.constant 0 : index
      %24 = vector.load %arg4[%c0_10, %c0_11] : memref<8x128xf32, #tpu.memory_space<vmem>>, vector<8x128xf32>
      %25 = vector.shape_cast %23 : vector<16x128xf32> to vector<2x8x128xf32>
      %cst_12 = arith.constant dense<0.000000e+00> : vector<8x128xf32>
      %26 = vector.multi_reduction <add>, %25, %cst_12 [0] : vector<2x8x128xf32> to vector<8x128xf32>
      %27 = arith.addf %24, %26 : vector<8x128xf32>
      %c0_13 = arith.constant 0 : index
      %c0_14 = arith.constant 0 : index
      %28 = vector.load %arg4[%c0_13, %c0_14] : memref<8x128xf32, #tpu.memory_space<vmem>>, vector<8x128xf32>
      tpu.vector_store %arg4[%c0_13, %c0_14], %27 {strides = array<i32>} : memref<8x128xf32, #tpu.memory_space<vmem>>, vector<8x128xf32>,
    } else {
    }
    %c1_i32_3 = arith.constant 1 : i32
    %8 = arith.cmpi sge, %1, %c1_i32_3 : i32
    %9 = arith.extui %8 : i1 to i32
    %c0_i32_4 = arith.constant 0 : i32
    %10 = arith.cmpi ne, %9, %c0_i32_4 : i32
    scf.if %10 {
      %c16_i32 = arith.constant 16 : i32
      %11 = arith.muli %1, %c16_i32 : i32
      %12 = tpu.iota {dimensions = array<i32: 0>} : vector<16x128xi32>
      %13 = vector.broadcast %11 : i32 to vector<16x128xi32>
      %14 = arith.addi %13, %12 : vector<16x128xi32>
      %c16_i32_5 = arith.constant 16 : i32
      %15 = vector.broadcast %c16_i32_5 : i32 to vector<16x128xi32>
      %16 = arith.cmpi slt, %14, %15 : vector<16x128xi32>
      %c0 = arith.constant 0 : index
      %c0_6 = arith.constant 0 : index
      %17 = vector.load %arg2[%c0, %c0_6] : memref<16x128xf32, #tpu.memory_space<vmem>>, vector<16x128xf32>
      %cst = arith.constant 5.000000e-01 : f32
      %18 = vector.broadcast %cst : f32 to vector<16x128xf32>
      %19 = arith.select %16, %17, %18 : vector<16x128xi1>, vector<16x128xf32>
      %c0_7 = arith.constant 0 : index
      %c0_8 = arith.constant 0 : index
      %20 = vector.load %arg3[%c0_7, %c0_8] : memref<16x128xf32, #tpu.memory_space<vmem>>, vector<16x128xf32>
      %cst_9 = arith.constant 0.000000e+00 : f32
      %21 = vector.broadcast %cst_9 : f32 to vector<16x128xf32>
      %22 = arith.select %16, %20, %21 : vector<16x128xi1>, vector<16x128xf32>
      %23 = math.log %19 : vector<16x128xf32>
      %cst_10 = arith.constant -1.000000e+02 : f32
      %24 = vector.broadcast %cst_10 : f32 to vector<16x128xf32>
      %25 = arith.maximumf %23, %24 : vector<16x128xf32>
      %cst_11 = arith.constant 1.000000e+00 : f32
      %26 = vector.broadcast %cst_11 : f32 to vector<16x128xf32>
      %27 = arith.subf %26, %19 : vector<16x128xf32>
      %28 = math.log %27 : vector<16x128xf32>
      %cst_12 = arith.constant -1.000000e+02 : f32
      %29 = vector.broadcast %cst_12 : f32 to vector<16x128xf32>
      %30 = arith.maximumf %28, %29 : vector<16x128xf32>
      %31 = arith.subf %25, %30 : vector<16x128xf32>
      %32 = arith.mulf %22, %31 : vector<16x128xf32>
      %33 = arith.addf %30, %32 : vector<16x128xf32>
      %cst_13 = arith.constant 0.000000e+00 : f32
      %34 = vector.broadcast %cst_13 : f32 to vector<16x128xf32>
      %35 = arith.select %16, %33, %34 : vector<16x128xi1>, vector<16x128xf32>
      %c0_14 = arith.constant 0 : index
      %c0_15 = arith.constant 0 : index
      %36 = vector.load %arg4[%c0_14, %c0_15] : memref<8x128xf32, #tpu.memory_space<vmem>>, vector<8x128xf32>
      %37 = vector.shape_cast %35 : vector<16x128xf32> to vector<2x8x128xf32>
      %cst_16 = arith.constant dense<0.000000e+00> : vector<8x128xf32>
      %38 = vector.multi_reduction <add>, %37, %cst_16 [0] : vector<2x8x128xf32> to vector<8x128xf32>
      %39 = arith.addf %36, %38 : vector<8x128xf32>
      %c0_17 = arith.constant 0 : index
      %c0_18 = arith.constant 0 : index
      %40 = vector.load %arg4[%c0_17, %c0_18] : memref<8x128xf32, #tpu.memory_space<vmem>>, vector<8x128xf32>
      tpu.vector_store %arg4[%c0_17, %c0_18], %39 {strides = array<i32>} : memref<8x128xf32, #tpu.memory_space<vmem>>, vector<8x128xf32>,
    } else {
    }
    return
  }
  func.func @transform_0(%arg0: i32, %arg1: i32) -> (i32, i32) {
    %c1_i32 = arith.constant 1 : i32
    %0 = arith.muli %arg0, %c1_i32 : i32
    %1 = arith.addi %0, %arg1 : i32
    %c0_i32 = arith.constant 0 : i32
    %2 = arith.minsi %1, %c0_i32 : i32
    %c0_i32_0 = arith.constant 0 : i32
    %c0_i32_1 = arith.constant 0 : i32
    return %2, %c0_i32_0 : i32, i32
  }
  func.func @transform_1(%arg0: i32, %arg1: i32) -> (i32, i32) {
    %c1_i32 = arith.constant 1 : i32
    %0 = arith.muli %arg0, %c1_i32 : i32
    %1 = arith.addi %0, %arg1 : i32
    %c0_i32 = arith.constant 0 : i32
    %2 = arith.minsi %1, %c0_i32 : i32
    %c0_i32_0 = arith.constant 0 : i32
    %c0_i32_1 = arith.constant 0 : i32
    return %2, %c0_i32_0 : i32, i32
  }
  func.func @transform_2(%arg0: i32, %arg1: i32) -> (i32, i32) {
    %c0_i32 = arith.constant 0 : i32
    %c0_i32_0 = arith.constant 0 : i32
    return %arg0, %c0_i32 : i32, i32
  }
}

</mosaic_0001>

<bundles_post_ra>
// kernel: tpu_custom_call.1
= control target key start
LH: loop header
LB: loop body
LE: loop exit
PB: predicated region body
PF: predicated region fallthrough
CT: control target
= control target key end

     0   :  { %7 = vsyncpa [#allocation3], 0  ;;  %s993_s0 = inlined_call_operand.hbm [shape: f32[16,128], index: 0, kind: input, shape index: {}]   ;;  %s994_s1 = inlined_call_operand.hbm [shape: f32[16,128], index: 1, kind: input, shape index: {}]   ;;  %s995_s2 = inlined_call_operand.hbm [shape: f32[16,128], index: 2, kind: output, shape index: {}]  }
   0x1   :  { %9 = vsyncpa [#allocation3 + $0x1], 0 }
   0x2   :  { %10 = vsyncpa [#allocation6], 0 }
   0x3   :  { %12 = vsyncpa [#allocation6 + $0x1], 0 }
   0x4   :  { %13 = vsyncpa [#allocation4], 0 }
   0x5   :  { %15 = vsyncpa [#allocation4 + $0x1], 0  ;;  %s763_s9 = smov 0   ;;  %s765_s10 = smov 0  }
   0x6   :  { %s767_s11 = smov 0   ;;  %s769_s12 = smov 0  }
   0x7   :  { %s771_s13 = smov 0   ;;  %s773_s14 = smov 0  }
   0x8   :  { %s775_s15 = smov 0   ;;  %s777_s16 = smov 0  }
   0x9 LB: > { %s440_s17 = sadd.s32 4294967295, %s740_s16   ;;  %s441_s18 = sadd.s32 4294967294, %s740_s16   ;;  %s740_s16 = sphi %s777_s16, %s21_s16   ;;  %s736_s15 = sphi %s775_s15, %s1014_s15   ;;  %s732_s14 = sphi %s773_s14, %s1013_s14   ;;  %s728_s13 = sphi %s771_s13, %s983_s13   ;;  %s724_s12 = sphi %s769_s12, %s1012_s12   ;;  %s720_s11 = sphi %s767_s11, %s1011_s11   ;;  %s716_s10 = sphi %s765_s10, %s1010_s10   ;;  %s712_s9 = sphi %s763_s9, %s1009_s9  }
   0xa   : > { %s33_s19 = sadd.s32 1, %s736_s15  ;;  %p709_p1 = scmp.ne.s32.totalorder %s728_s13, 0 }
   0xb   : > { %p35_p0 = scmp.ge.s32.totalorder %s33_s19, 2  ;;  %p54_p2 = scmp.eq.s32.totalorder %s740_s16, 0 }
   0xc   : > { %p59_p3 = scmp.ne.s32.totalorder %s728_s13, %s724_s12  ;;  %p60_p5 = scmp.eq.s32.totalorder %s440_s17, 0 }
   0xd   : > { %s1016_s19 = smov (%p35_p0, %s33_s19), 0  ;;  %p809_p4 = por %p709_p1, %p54_p2 }
   0xe   : > { %p813_p6 = por %p60_p5, %p59_p3  ;;  %s101_s22 = ssub.s32 %s736_s15, %s1016_s19 }
   0xf   : > { %p102_p7 = scmp.eq.s32.totalorder %s101_s22, 0  ;;  %s104_s23 = sadd.s32 1, %s720_s11 }
  0x10   : > { %s999_s21 = scalar_select %p813_p6, 1, 0 }
  0x11   : > { %s821_s24 = scalar_select %p102_p7, %s720_s11, %s104_s23  }
  0x12   : > { %p114_p8 = scmp.ne.s32.totalorder %s720_s11, %s716_s10  ;;  %p115_p9 = scmp.eq.s32.totalorder %s440_s17, 1 }
  0x13   : > { %p120_p10 = scmp.ne.s32.totalorder %s716_s10, %s712_s9  ;;  %p121_p11 = scmp.eq.s32.totalorder %s441_s18, 1 }
  0x14   : > { %p827_p12 = por %p115_p9, %p114_p8  ;;  %p480_p1 = scmp.lt.s32.totalorder %s740_s16, 2 }
  0x15   : > { %p832_p0 = por %p121_p11, %p120_p10  ;;  %s742_s27 = smov [#allocation2]  }
  0x16   : > { %s1000_s25 = scalar_select %p827_p12, 1, 0 }
  0x17   : > { %s1001_s26 = scalar_select %p832_p0, 1, 0 }
  0x18   : > { %s155_s28 = sshll.u32 %s742_s27, 4  ;;  %p839_p2 = pnand %p480_p1, %p809_p4  ;;  %s156_s28 = int_to_ptr.vmem [resolvable:$true] %s155_s28 }
  0x19   : > { %s573_s4 = scalar_lea.hbm %s993_s0, 256 }
  0x1a   : > { %p574_p3 = scmp.ne.s32.totalorder %s993_s0, %s573_s4  ;;  %p575_p5 = pneg %p839_p2 }
  0x1b   : > { %p580_p8 = scmp.lt.u32.totalorder %s573_s4, %s573_s4  ;;  %p582_p9 = scmp.lt.u32.totalorder %s573_s4, %s993_s0 }
  0x1c   : > { %p576_p7 = pnand %p575_p5, %p574_p3 }
  0x1d   : > { %p583_p10 = por %p582_p9, %p580_p8 }
  0x1e   : > { %p577_p4 = pneg %p576_p7 }
  0x20   : > { %p584_p11 = pnand %p583_p10, %p577_p4 }
  0x22   : > { %587 = shalt.err (!%p584_p11)
}
  0x23   : > { %s588_s12 = scalar_lea.vmem %s156_s28, 256  ;;  %s595_s17 = scalar_lea.vmem %s156_s28, 512 }
  0x24   : > { %p589_p1 = scmp.ne.s32.totalorder %s156_s28, %s588_s12  ;;  %p596_p12 = scmp.lt.s32.totalorder %s156_s28, %s156_s28 }
  0x25   : > { %p597_p6 = scmp.lt.s32.totalorder %s595_s17, %s588_s12 }
  0x26   : > { %p591_p13 = pnand %p589_p1, %p575_p5 }
  0x27   : > { %p598_p3 = por %p597_p6, %p596_p12 }
  0x28   : > { %p592_p0 = pneg %p591_p13 }
  0x2a   : > { %p599_p7 = pnand %p598_p3, %p592_p0 }
  0x2c   : > { %602 = shalt.err (!%p599_p7)
}
  0x2d   : > { %s743_s18 = smov 128   ;;  %s744_s20 = smov 8  }
  0x2e   : > { %472 = dma.hbm_to_vmem [thread:$0]  (!%p839_p2), %s993_s0, 256, %s156_s28, [#allocation3], %s743_s18, %s743_s18, %s744_s20  }
  0x2f   : > { %p450_p13 = scmp.ge.s32.totalorder %s740_s16, 1  ;;  %p187_p4 = scmp.lt.s32.totalorder %s740_s16, 3 }
  0x30   : > { %s745_s30 = smov [#allocation5]   ;;  %s603_s6 = scalar_lea.hbm %s994_s1, 256 }
  0x31   : > { %p870_p8 = pnand %p450_p13, %p187_p4  ;;  %s179_s3 = sshll.u32 %s745_s30, 4  ;;  %s180_s3 = int_to_ptr.vmem [resolvable:$true] %s179_s3 }
  0x32   : > { %p604_p6 = scmp.ne.s32.totalorder %s994_s1, %s603_s6  ;;  %p610_p9 = scmp.lt.u32.totalorder %s603_s6, %s603_s6 }
  0x33   : > { %s1003_s27 = scalar_select %p870_p8, 1, 0 }
  0x34   : > { %p606_p12 = pnand %p604_p6, %p575_p5  ;;  %p612_p10 = scmp.lt.u32.totalorder %s603_s6, %s994_s1 }
  0x36   : > { %p607_p0 = pneg %p606_p12  ;;  %p613_p11 = por %p612_p10, %p610_p9 }
  0x38   : > { %p614_p1 = pnand %p613_p11, %p607_p0 }
  0x3a   : > { %617 = shalt.err (!%p614_p1)
}
  0x3b   : > { %s618_s17 = scalar_lea.vmem %s180_s3, 256  ;;  %s625_s22 = scalar_lea.vmem %s180_s3, 512 }
  0x3c   : > { %p619_p3 = scmp.ne.s32.totalorder %s180_s3, %s618_s17  ;;  %p626_p4 = scmp.lt.s32.totalorder %s180_s3, %s180_s3 }
  0x3d   : > { %p627_p8 = scmp.lt.s32.totalorder %s625_s22, %s618_s17 }
  0x3e   : > { %p621_p7 = pnand %p619_p3, %p575_p5 }
  0x3f   : > { %p628_p6 = por %p627_p8, %p626_p4 }
  0x40   : > { %p622_p13 = pneg %p621_p7 }
  0x42   : > { %p629_p12 = pnand %p628_p6, %p622_p13 }
  0x44   : > { %632 = shalt.err (!%p629_p12)
}
  0x45   : > { %475 = dma.hbm_to_vmem [thread:$0]  (!%p839_p2), %s994_s1, 256, %s180_s3, [#allocation6], %s743_s18, %s743_s18, %s744_s20  }
  0x46   : > { %p1004_p0 = scmp.ne.s32.totalorder %s1003_s27, 0 }
  0x47   : > { %s193_s4 = sand.u32 (!%p1004_p0), 1, %s728_s13   ;;  %p1005_p5 = scmp.ne.s32.totalorder (!%p1004_p0), %s999_s21, 0 }
  0x48   : > { %191 = sbr.rel (%p1004_p0) target bundleno = 178 (0xb2), region = 28  ;;  %s451_s5 = sshll.u32 (!%p1004_p0), %s193_s4, 4 }
  0x49   : > { %s194_s6 = scalar_lea.sflag (!%p1004_p0), [#allocation3], %s193_s4  ;;  %s900_s7 = scalar_lea.vmem (!%p1004_p0), [#allocation2], %s451_s5 }
  0x4f   : > { %698 = dma.done.wait (%p1005_p5), %s194_s6, 256  }
  0x50   : > { %700 = vsyncadd (%p1005_p5), %s194_s6, 4294967040  ;;  %s203_s29 = scalar_lea.sflag [#allocation6], %s193_s4  ;;  %s906_s8 = scalar_lea.vmem [#allocation5], %s451_s5 }
  0x51   : > { %702 = dma.done.wait (%p1005_p5), %s203_s29, 256  }
  0x52   : > { %704 = vsyncadd (%p1005_p5), %s203_s29, 4294967040  ;;  %s229_s18 = sand.u32 1, %s716_s10   ;;  %v746_v0 = vmov 0.0   ;;  %p454_p2 = scmp.ge.s32.totalorder %s732_s14, 1 }
  0x53   : > { %s453_s20 = sshll.u32 %s229_s18, 3  ;;  %v250_v1 = vld [vmem:[%s900_s7] sm:$0xff] (!%p454_p2)  ;;  %v251_v2 = vld [vmem:[%s900_s7 + $0x8] sm:$0xff] (!%p454_p2) }
  0x54   : > { %s915_s27 = scalar_lea.vmem [#allocation7], %s453_s20  ;;  %249 = sbr.rel (%p454_p2) target bundleno = 113 (0x71), region = 44  ;;  %557 = vlog2.f32 (!%p454_p2), %v250_v1  ;;  %v260_v3 = vsub.f32 (!%p454_p2), 1.0, %v250_v1  ;;  %v261_v4 = vsub.f32 (!%p454_p2), 1.0, %v251_v2  ;;  %v252_v16 = vld [vmem:[%s906_s8] sm:$0xff] (!%p454_p2)  ;;  %v253_v18 = vld [vmem:[%s906_s8 + $0x8] sm:$0xff] (!%p454_p2) }
  0x55   : > { %245 = vst [vmem:[%s915_s27] sm:$0xff] %v746_v0  ;;  %559 = vlog2.f32 (!%p454_p2), %v251_v2 }
  0x56   : > { %561 = vlog2.f32 (!%p454_p2), %v260_v3 }
  0x57   : > { %563 = vlog2.f32 (!%p454_p2), %v261_v4 }
  0x5c   : > { %v274_v25 = vld [vmem:[%s915_s27] sm:$0xff] }
  0x5e   : > { %v558_v5 = vpop.eup %557 }
  0x5f   : > { %v560_v6 = vpop.eup %559  ;;  %v255_v7 = vmul.f32 0.6931472, %v558_v5 }
  0x60   : > { %v562_v8 = vpop.eup %561  ;;  %v257_v9 = vmul.f32 0.6931472, %v560_v6 }
  0x61   : > { %v564_v10 = vpop.eup %563  ;;  %v258_v11 = vmax.f32 %v255_v7, -100.0  ;;  %v263_v12 = vmul.f32 0.6931472, %v562_v8 }
  0x62   : > { %v259_v13 = vmax.f32 %v257_v9, -100.0  ;;  %v265_v14 = vmul.f32 0.6931472, %v564_v10 }
  0x63   : > { %v266_v15 = vmax.f32 %v263_v12, -100.0 }
  0x64   : > { %v267_v17 = vmax.f32 %v265_v14, -100.0 }
  0x65   : > { %v268_v19 = vsub.f32 %v258_v11, %v266_v15 }
  0x66   : > { %v269_v20 = vsub.f32 %v259_v13, %v267_v17 }
  0x67   : > { %v270_v21 = vmul.f32 %v268_v19, %v252_v16 }
  0x68   : > { %v271_v22 = vmul.f32 %v269_v20, %v253_v18 }
  0x69   : > { %v272_v23 = vadd.f32 %v270_v21, %v266_v15 }
  0x6a   : > { %v273_v24 = vadd.f32 %v271_v22, %v267_v17 }
  0x6c   : > { %v275_v26 = vadd.f32 %v273_v24, %v272_v23 }
  0x6e   : > { %v276_v27 = vadd.f32 %v275_v26, %v274_v25 }
  0x70   : > { %277 = vst [vmem:[%s915_s27] sm:$0xff] %v276_v27 }
  0x71 PF: > { %p455_p8 = scmp.lt.s32.totalorder %s732_s14, 1 }
  0x72   : > { %s456_s21 = sshll.u32 (!%p455_p8), %s732_s14, 4  ;;  %v283_v28 = vlaneseq (!%p455_p8)  ;;  %v291_v33 = vld [vmem:[%s900_s7] sm:$0xff] (!%p455_p8)  ;;  %v292_v35 = vld [vmem:[%s900_s7 + $0x8] sm:$0xff] (!%p455_p8) }
  0x73   : > { %281 = sbr.rel (%p455_p8) target bundleno = 153 (0x99), region = 48  ;;  %v286_v29 = vstv (!%p455_p8), %s456_s21  ;;  %v295_v46 = vld [vmem:[%s906_s8] sm:$0xff] (!%p455_p8)  ;;  %v296_v49 = vld [vmem:[%s906_s8 + $0x8] sm:$0xff] (!%p455_p8) }
  0x74   : > { %v284_v30 = vshrl.u32 (!%p455_p8), %v283_v28, 7 }
  0x76   : > { %v285_v31 = vadd.s32 (!%p455_p8), 8, %v284_v30  ;;  %v287_v32 = vadd.s32 (!%p455_p8), %v286_v29, %v284_v30 }
  0x77   : > { %v321_v0 = vld [vmem:[%s915_s27] sm:$0xff] (!%p455_p8) }
  0x78   : > { %v288_v34 = vadd.s32 (!%p455_p8), %v286_v29, %v285_v31  ;;  %vm289_vm0 = vcmp.lt.s32.totalorder (!%p455_p8), %v287_v32, 16 }
  0x79   : > { %v293_v36 = vsel (!%p455_p8), %vm289_vm0, %v291_v33, 0.5  ;;  %v297_v53 = vsel (!%p455_p8), %vm289_vm0, %v295_v46, 0.0 }
  0x7a   : > { %vm290_vm1 = vcmp.lt.s32.totalorder %v288_v34, 16  ;;  %565 = vlog2.f32 %v293_v36  ;;  %v305_v37 = vsub.f32 1.0, %v293_v36 }
  0x7b   : > { %v294_v38 = vsel %vm290_vm1, %v292_v35, 0.5  ;;  %v298_v55 = vsel %vm290_vm1, %v296_v49, 0.0 }
  0x7c   : > { %567 = vlog2.f32 %v294_v38  ;;  %v306_v39 = vsub.f32 1.0, %v294_v38 }
  0x7d   : > { %569 = vlog2.f32 %v305_v37 }
  0x7e   : > { %571 = vlog2.f32 %v306_v39 }
  0x84   : > { %v566_v40 = vpop.eup %565 }
  0x85   : > { %v300_v41 = vmul.f32 0.6931472, %v566_v40 }
  0x86   : > { %v568_v42 = vpop.eup %567 }
  0x87   : > { %v570_v43 = vpop.eup %569  ;;  %v302_v44 = vmul.f32 0.6931472, %v568_v42  ;;  %v303_v47 = vmax.f32 %v300_v41, -100.0 }
  0x88   : > { %v572_v45 = vpop.eup %571  ;;  %v308_v48 = vmul.f32 0.6931472, %v570_v43 }
  0x89   : > { %v304_v50 = vmax.f32 %v302_v44, -100.0  ;;  %v310_v51 = vmul.f32 0.6931472, %v572_v45 }
  0x8a   : > { %v311_v52 = vmax.f32 %v308_v48, -100.0 }
  0x8b   : > { %v312_v54 = vmax.f32 %v310_v51, -100.0 }
  0x8c   : > { %v313_v56 = vsub.f32 %v303_v47, %v311_v52 }
  0x8d   : > { %v314_v57 = vsub.f32 %v304_v50, %v312_v54 }
  0x8e   : > { %v315_v58 = vmul.f32 %v313_v56, %v297_v53 }
  0x8f   : > { %v316_v59 = vmul.f32 %v314_v57, %v298_v55 }
  0x90   : > { %v317_v60 = vadd.f32 %v315_v58, %v311_v52 }
  0x91   : > { %v318_v61 = vadd.f32 %v316_v59, %v312_v54 }
  0x92   : > { %v319_v62 = vsel %vm289_vm0, %v317_v60, 0.0 }
  0x93   : > { %v320_v63 = vsel %vm290_vm1, %v318_v61, 0.0 }
  0x94   : > { %v322_v1 = vadd.f32 %v320_v63, %v319_v62 }
  0x96   : > { %v323_v2 = vadd.f32 %v322_v1, %v321_v0 }
  0x98   : > { %324 = vst [vmem:[%s915_s27] sm:$0xff] %v323_v2 }
  0x99 PF: > { %s458_s3 = sshll.u32 %s732_s14, 7  ;;  %s339_s22 = sshll.u32 %s915_s27, 4  ;;  %s340_s22 = int_to_ptr.vmem [resolvable:$true] %s339_s22 }
  0x9a   : > { %s943_s17 = scalar_lea.hbm %s995_s2, %s458_s3  ;;  %s326_s23 = scalar_lea.sflag [#allocation4], %s229_s18 }
  0x9b   : > { %s633_s30 = scalar_lea.vmem %s340_s22, 128  ;;  %p1006_p10 = scmp.ne.s32.totalorder %s1000_s25, 0 }
  0x9c   : > { %p634_p9 = scmp.ne.s32.totalorder %s340_s22, %s633_s30  ;;  %s747_s4 = smov [#allocation7]  }
  0x9d   : > { %s637_s5 = sshll.u32 %s747_s4, 4  ;;  %s638_s5 = int_to_ptr.vmem [resolvable:$false] %s637_s5 }
  0x9e   : > { %p635_p11 = pnand %p634_p9, %p1006_p10  ;;  %s639_s6 = scalar_lea.vmem %s638_s5, 256 }
  0x9f   : > { %p640_p3 = scmp.lt.s32.totalorder %s340_s22, %s638_s5  ;;  %p641_p7 = scmp.lt.s32.totalorder %s639_s6, %s633_s30 }
  0xa0   : > { %p636_p1 = pneg %p635_p11 }
  0xa1   : > { %p642_p13 = por %p641_p7, %p640_p3 }
  0xa3   : > { %p643_p4 = pnand %p642_p13, %p636_p1 }
  0xa5   : > { %646 = shalt.err (!%p643_p4)
}
  0xa6   : > { %s647_s14 = scalar_lea.hbm %s943_s17, 128  ;;  %s651_s8 = scalar_lea.hbm %s995_s2, 256 }
  0xa7   : > { %p648_p6 = scmp.ne.s32.totalorder %s943_s17, %s647_s14  ;;  %p652_p5 = scmp.lt.u32.totalorder %s943_s17, %s995_s2 }
  0xa8   : > { %p653_p2 = scmp.lt.u32.totalorder %s651_s8, %s647_s14  ;;  %p655_p9 = scmp.lt.u32.totalorder %s647_s14, %s943_s17 }
  0xa9   : > { %p649_p12 = pnand %p648_p6, %p1006_p10 }
  0xaa   : > { %p654_p8 = por %p653_p2, %p652_p5 }
  0xab   : > { %p650_p0 = pneg %p649_p12 }
  0xac   : > { %p656_p11 = por %p655_p9, %p654_p8 }
  0xae   : > { %p657_p1 = pnand %p656_p11, %p650_p0 }
  0xb0   : > { %660 = shalt.err (!%p657_p1)
}
  0xb1   : > { %467 = dma.vmem_to_hbm [thread:$0]  (%p1006_p10), %s340_s22, 128, %s943_s17, %s326_s23  }
  0xb2 PF: > { %s351_s27 = sand.u32 1, %s712_s9   ;;  %p1007_p3 = scmp.ne.s32.totalorder %s1001_s26, 0 }
  0xb3   : > { %p1008_p7 = scmp.ge.s32.totalorder %s740_s16, 2  ;;  %s352_s21 = scalar_lea.sflag [#allocation4], %s351_s27 }
  0xb5   : > { %p477_p13 = pnand %p1008_p7, %p1007_p3 }
  0xb7   : > { %706 = dma.done.wait (!%p477_p13), %s352_s21, 128  }
  0xb8   : > { %708 = vsyncadd (!%p477_p13), %s352_s21, 4294967168  ;;  %s21_s16 = sadd.s32 1, %s740_s16   ;;  %s1009_s9 = smov %s716_s10 }
  0xb9   : > { %p18_p4 = scmp.ge.s32.totalorder %s21_s16, 4   ;;  %s1010_s10 = smov %s720_s11 }
  0xba   : > { %s1011_s11 = smov %s821_s24  ;;  %s1012_s12 = smov %s728_s13 }
  0xbb   : > { %s983_s13 = smov 0   ;;  %s1013_s14 = smov %s736_s15 }
  0xbc   : > { %s1014_s15 = smov %s1016_s19  ;;  %20 = sbr.rel (!%p18_p4) target bundleno = 9 (0x9), region = 98 }
  0xc3   :  { %357 = vsyncpa [#allocation3], 1 }
  0xc4   :  { %359 = vsyncpa [#allocation3 + $0x1], 1 }
  0xc5   :  { %360 = vsyncpa [#allocation6], 1 }
  0xc6   :  { %362 = vsyncpa [#allocation6 + $0x1], 1 }
  0xc7   :  { %363 = vsyncpa [#allocation4], 1 }
  0xc8   :  { %365 = vsyncpa [#allocation4 + $0x1], 1 }

</bundles_post_ra>
